<compile_context>
chip_gen: v5e
topology: v5e:2x2
jax: 0.10.0
libtpu: 0.0.40
codegen_flags: <defaults>
</compile_context>

<pallas_src>
import functools

import jax
import jax.numpy as jnp
from jax.experimental import pallas as pl
from jax.experimental.pallas import tpu as pltpu


def _fill_im2col(col_ref, a, width, mask_l, mask_r):
    """Write the 3x3 im2col matrix of `a` into `col_ref`.

    a       : (C, M) value, M = H*W, row-major flattened spatial.
    col_ref : (9*C, M) VMEM scratch.  Row t*C + c holds channel c of `a`
              shifted by tap t (t = ky*3 + kx, offsets dy=ky-1, dx=kx-1),
              with zeros where the tap falls outside the image.
    mask_l / mask_r : (1, M) 0/1 float masks for the dx=-1 / dx=+1 taps
              (horizontal validity; vertical validity is handled by the
              zero edge strips of the flat shift).
    """
    c, n = a.shape
    t = 0
    for ky in range(3):
        for kx in range(3):
            dy, dx = ky - 1, kx - 1
            s = dy * width + dx          # flat shift: out[m] reads a[m + s]
            lo = max(0, -s)
            hi = n - max(0, s)
            src = a[:, lo + s:hi + s]    # (c, hi - lo)
            if dx == -1:
                src = src * mask_l[:, lo:hi]
            elif dx == 1:
                src = src * mask_r[:, lo:hi]
            col_ref[pl.ds(t * c, c), pl.ds(lo, hi - lo)] = src
            if lo > 0:                   # leading edge strip -> zeros
                col_ref[pl.ds(t * c, c), pl.ds(0, lo)] = jnp.zeros(
                    (c, lo), a.dtype)
            if hi < n:                   # trailing edge strip -> zeros
                col_ref[pl.ds(t * c, c), pl.ds(hi, n - hi)] = jnp.zeros(
                    (c, n - hi), a.dtype)
            t += 1


def _double_conv_kernel(width, x_ref, wm_ref, w1_ref, b1_ref, w2_ref, b2_ref,
                        out_ref, col1_ref, col2_ref):
    # x_ref   : (nb, Cin, M)    flattened-NCHW input block
    # wm_ref  : (2, M)          0/1 horizontal-validity masks (dx=-1, dx=+1)
    # w1_ref  : (Cmid, 9*Cin)   conv1 weights, columns ordered (ky, kx, cin)
    # b1_ref  : (Cmid, 1)
    # w2_ref  : (Cout, 9*Cmid)  conv2 weights
    # b2_ref  : (Cout, 1)
    # out_ref : (nb, Cout, M)   flattened-NCHW output block (lane-dense M)
    # col1_ref/col2_ref : VMEM im2col scratch, (9*Cin, M) / (9*Cmid, M)
    nb = x_ref.shape[0]
    masks = wm_ref[...]
    mask_l = masks[0:1, :]
    mask_r = masks[1:2, :]

    for b in range(nb):
        x = x_ref[b]                                      # (Cin, M) f32
        _fill_im2col(col1_ref, x, width, mask_l, mask_r)
        h1 = jnp.dot(w1_ref[...], col1_ref[...],
                     preferred_element_type=jnp.float32)  # (Cmid, M)
        h1 = jnp.maximum(h1 + b1_ref[...], 0.0)
        _fill_im2col(col2_ref, h1, width, mask_l, mask_r)
        h2 = jnp.dot(w2_ref[...], col2_ref[...],
                     preferred_element_type=jnp.float32)  # (Cout, M)
        h2 = jnp.maximum(h2 + b2_ref[...], 0.0)
        out_ref[b] = h2.astype(out_ref.dtype)


def double_conv_nobn(x_nchw, w1, b1, w2, b2, *, block_n=1):
    """x_nchw: (N, Cin, H, W) f32; w*: PyTorch (Cout, Cin, 3, 3); b*: (Cout,).
    Returns (N, Cout, H, W) f32 == Conv2d(3x3,p=1)->ReLU->Conv2d(3x3,p=1)->ReLU.
    """
    n, cin, h, w = x_nchw.shape
    cmid = w1.shape[0]
    cout = w2.shape[0]
    m = h * w
    assert n % block_n == 0, "block_n must divide the batch size"

    # Flattened NCHW (free reshape; no transpose / pad pass over HBM).
    x = x_nchw.reshape(n, cin, m).astype(jnp.float32)

    # OIHW -> (Cout, 3, 3, Cin) -> (Cout, 9*Cin); column index = (ky,kx,ci),
    # matching the row order produced by _fill_im2col.
    w1k = jnp.transpose(w1, (0, 2, 3, 1)).reshape(cmid, 9 * cin)
    w1k = w1k.astype(jnp.float32)
    w2k = jnp.transpose(w2, (0, 2, 3, 1)).reshape(cout, 9 * cmid)
    w2k = w2k.astype(jnp.float32)
    b1k = b1.reshape(cmid, 1).astype(jnp.float32)
    b2k = b2.reshape(cout, 1).astype(jnp.float32)

    # 0/1 lane masks for the dx = -1 / +1 taps (precomputed on the host side
    # so the kernel needs no iota/mod work).  Flat index -> column = idx % W.
    col_pos = jnp.arange(m, dtype=jnp.int32) % w
    wmask = jnp.stack([(col_pos >= 1).astype(jnp.float32),
                       (col_pos <= w - 2).astype(jnp.float32)], axis=0)

    kernel = functools.partial(_double_conv_kernel, w)

    out_flat = pl.pallas_call(
        kernel,
        out_shape=jax.ShapeDtypeStruct((n, cout, m), jnp.float32),
        grid_spec=pltpu.PrefetchScalarGridSpec(
            num_scalar_prefetch=0,
            grid=(n // block_n,),
            in_specs=[
                pl.BlockSpec((block_n, cin, m), lambda i: (i, 0, 0)),
                pl.BlockSpec((2, m), lambda i: (0, 0)),
                pl.BlockSpec((cmid, 9 * cin), lambda i: (0, 0)),
                pl.BlockSpec((cmid, 1), lambda i: (0, 0)),
                pl.BlockSpec((cout, 9 * cmid), lambda i: (0, 0)),
                pl.BlockSpec((cout, 1), lambda i: (0, 0)),
            ],
            out_specs=pl.BlockSpec((block_n, cout, m), lambda i: (i, 0, 0)),
            scratch_shapes=[
                pltpu.VMEM((9 * cin, m), jnp.float32),
                pltpu.VMEM((9 * cmid, m), jnp.float32),
            ],
        ),
        compiler_params=pltpu.CompilerParams(
            dimension_semantics=("parallel",)),
    )(x, wmask, w1k, b1k, w2k, b2k)

    return out_flat.reshape(n, cout, h, w)


def _reference(x, w1, b1, w2, b2):
    dn = ("NCHW", "OIHW", "NCHW")
    y = jax.lax.conv_general_dilated(x, w1, (1, 1), ((1, 1), (1, 1)),
                                     dimension_numbers=dn)
    y = jax.nn.relu(y + b1[None, :, None, None])
    y = jax.lax.conv_general_dilated(y, w2, (1, 1), ((1, 1), (1, 1)),
                                     dimension_numbers=dn)
    return jax.nn.relu(y + b2[None, :, None, None])


if __name__ == "__main__":
    # Small deterministic setup consistent with DoubleConv_nobn(in=4, out=8).
    N, Cin, H, W = 2, 4, 16, 16
    Cmid = Cout = 8

    key = jax.random.PRNGKey(0)
    kx, kw1, kb1, kw2, kb2 = jax.random.split(key, 5)

    x = jax.random.normal(kx, (N, Cin, H, W), jnp.float32)

    # PyTorch-style uniform(-1/sqrt(fan_in), 1/sqrt(fan_in)) init.
    fan1 = Cin * 9
    w1 = jax.random.uniform(kw1, (Cmid, Cin, 3, 3), jnp.float32,
                            -1.0 / fan1 ** 0.5, 1.0 / fan1 ** 0.5)
    b1 = jax.random.uniform(kb1, (Cmid,), jnp.float32,
                            -1.0 / fan1 ** 0.5, 1.0 / fan1 ** 0.5)
    fan2 = Cmid * 9
    w2 = jax.random.uniform(kw2, (Cout, Cmid, 3, 3), jnp.float32,
                            -1.0 / fan2 ** 0.5, 1.0 / fan2 ** 0.5)
    b2 = jax.random.uniform(kb2, (Cout,), jnp.float32,
                            -1.0 / fan2 ** 0.5, 1.0 / fan2 ** 0.5)

    out = double_conv_nobn(x, w1, b1, w2, b2)
    out = jax.block_until_ready(out)

    ref = jax.block_until_ready(_reference(x, w1, b1, w2, b2))
    assert out.shape == (N, Cout, H, W), out.shape
    assert jnp.allclose(out, ref, atol=1e-4, rtol=1e-4), \
        float(jnp.max(jnp.abs(out - ref)))

    print("KERNEL_OK")
</pallas_src>

<mosaic_0001>
module attributes {stable_mosaic.version = 11 : i64} {
  func.func @_double_conv_kernel(%arg0: i32, %arg1: memref<1x4x256xf32, #tpu.memory_space<vmem>>, %arg2: memref<2x256xf32, #tpu.memory_space<vmem>>, %arg3: memref<8x36xf32, #tpu.memory_space<vmem>>, %arg4: memref<8x1xf32, #tpu.memory_space<vmem>>, %arg5: memref<8x72xf32, #tpu.memory_space<vmem>>, %arg6: memref<8x1xf32, #tpu.memory_space<vmem>>, %arg7: memref<1x8x256xf32, #tpu.memory_space<vmem>>, %arg8: memref<36x256xf32, #tpu.memory_space<vmem>>, %arg9: memref<72x256xf32, #tpu.memory_space<vmem>>) attributes {dimension_semantics = [#tpu.dimension_semantics<parallel>], iteration_bounds = array<i64: 2>, scalar_prefetch = 0 : i64, scratch_operands = 2 : i64, tpu.core_type = #tpu.core_type<tc>, window_params = [{transform_indices = @transform_0, window_bounds = array<i64: 1, 4, 256>}, {pipeline_mode = #tpu.pipeline_mode<synchronous>, transform_indices = @transform_1, window_bounds = array<i64: 2, 256>}, {pipeline_mode = #tpu.pipeline_mode<synchronous>, transform_indices = @transform_2, window_bounds = array<i64: 8, 36>}, {pipeline_mode = #tpu.pipeline_mode<synchronous>, transform_indices = @transform_3, window_bounds = array<i64: 8, 1>}, {pipeline_mode = #tpu.pipeline_mode<synchronous>, transform_indices = @transform_4, window_bounds = array<i64: 8, 72>}, {pipeline_mode = #tpu.pipeline_mode<synchronous>, transform_indices = @transform_5, window_bounds = array<i64: 8, 1>}, {transform_indices = @transform_6, window_bounds = array<i64: 1, 8, 256>}]} {
    %c0 = arith.constant 0 : index
    %c0_0 = arith.constant 0 : index
    %0 = vector.load %arg2[%c0, %c0_0] : memref<2x256xf32, #tpu.memory_space<vmem>>, vector<2x256xf32>
    %1 = vector.extract_strided_slice %0 {offsets = [0, 0], sizes = [1, 256], strides = [1, 1]} : vector<2x256xf32> to vector<1x256xf32>
    %2 = vector.extract_strided_slice %0 {offsets = [1, 0], sizes = [1, 256], strides = [1, 1]} : vector<2x256xf32> to vector<1x256xf32>
    %c0_1 = arith.constant 0 : index
    %c0_2 = arith.constant 0 : index
    %c0_3 = arith.constant 0 : index
    %3 = vector.load %arg1[%c0_1, %c0_2, %c0_3] : memref<1x4x256xf32, #tpu.memory_space<vmem>>, vector<1x4x256xf32>
    %4 = vector.shape_cast %3 : vector<1x4x256xf32> to vector<4x256xf32>
    %5 = vector.extract_strided_slice %4 {offsets = [0, 0], sizes = [4, 239], strides = [1, 1]} : vector<4x256xf32> to vector<4x239xf32>
    %6 = vector.extract_strided_slice %1 {offsets = [0, 17], sizes = [1, 239], strides = [1, 1]} : vector<1x256xf32> to vector<1x239xf32>
    %7 = vector.broadcast %6 : vector<1x239xf32> to vector<4x239xf32>
    %8 = arith.mulf %5, %7 : vector<4x239xf32>
    %c0_4 = arith.constant 0 : index
    %c17 = arith.constant 17 : index
    %9 = vector.load %arg8[%c0_4, %c17] : memref<36x256xf32, #tpu.memory_space<vmem>>, vector<4x239xf32>
    tpu.vector_store %arg8[%c0_4, %c17], %8 {strides = array<i32>} : memref<36x256xf32, #tpu.memory_space<vmem>>, vector<4x239xf32>,
    %cst = arith.constant 0.000000e+00 : f32
    %10 = vector.broadcast %cst : f32 to vector<4x17xf32>
    %c0_5 = arith.constant 0 : index
    %c0_6 = arith.constant 0 : index
    %11 = vector.load %arg8[%c0_5, %c0_6] : memref<36x256xf32, #tpu.memory_space<vmem>>, vector<4x17xf32>
    tpu.vector_store %arg8[%c0_5, %c0_6], %10 {strides = array<i32>} : memref<36x256xf32, #tpu.memory_space<vmem>>, vector<4x17xf32>,
    %12 = vector.extract_strided_slice %4 {offsets = [0, 0], sizes = [4, 240], strides = [1, 1]} : vector<4x256xf32> to vector<4x240xf32>
    %c4 = arith.constant 4 : index
    %c16 = arith.constant 16 : index
    %13 = vector.load %arg8[%c4, %c16] : memref<36x256xf32, #tpu.memory_space<vmem>>, vector<4x240xf32>
    tpu.vector_store %arg8[%c4, %c16], %12 {strides = array<i32>} : memref<36x256xf32, #tpu.memory_space<vmem>>, vector<4x240xf32>,
    %cst_7 = arith.constant 0.000000e+00 : f32
    %14 = vector.broadcast %cst_7 : f32 to vector<4x16xf32>
    %c4_8 = arith.constant 4 : index
    %c0_9 = arith.constant 0 : index
    %15 = vector.load %arg8[%c4_8, %c0_9] : memref<36x256xf32, #tpu.memory_space<vmem>>, vector<4x16xf32>
    tpu.vector_store %arg8[%c4_8, %c0_9], %14 {strides = array<i32>} : memref<36x256xf32, #tpu.memory_space<vmem>>, vector<4x16xf32>,
    %16 = vector.extract_strided_slice %4 {offsets = [0, 0], sizes = [4, 241], strides = [1, 1]} : vector<4x256xf32> to vector<4x241xf32>
    %17 = vector.extract_strided_slice %2 {offsets = [0, 15], sizes = [1, 241], strides = [1, 1]} : vector<1x256xf32> to vector<1x241xf32>
    %18 = vector.broadcast %17 : vector<1x241xf32> to vector<4x241xf32>
    %19 = arith.mulf %16, %18 : vector<4x241xf32>
    %c8 = arith.constant 8 : index
    %c15 = arith.constant 15 : index
    %20 = vector.load %arg8[%c8, %c15] : memref<36x256xf32, #tpu.memory_space<vmem>>, vector<4x241xf32>
    tpu.vector_store %arg8[%c8, %c15], %19 {strides = array<i32>} : memref<36x256xf32, #tpu.memory_space<vmem>>, vector<4x241xf32>,
    %cst_10 = arith.constant 0.000000e+00 : f32
    %21 = vector.broadcast %cst_10 : f32 to vector<4x15xf32>
    %c8_11 = arith.constant 8 : index
    %c0_12 = arith.constant 0 : index
    %22 = vector.load %arg8[%c8_11, %c0_12] : memref<36x256xf32, #tpu.memory_space<vmem>>, vector<4x15xf32>
    tpu.vector_store %arg8[%c8_11, %c0_12], %21 {strides = array<i32>} : memref<36x256xf32, #tpu.memory_space<vmem>>, vector<4x15xf32>,
    %23 = vector.extract_strided_slice %4 {offsets = [0, 0], sizes = [4, 255], strides = [1, 1]} : vector<4x256xf32> to vector<4x255xf32>
    %24 = vector.extract_strided_slice %1 {offsets = [0, 1], sizes = [1, 255], strides = [1, 1]} : vector<1x256xf32> to vector<1x255xf32>
    %25 = vector.broadcast %24 : vector<1x255xf32> to vector<4x255xf32>
    %26 = arith.mulf %23, %25 : vector<4x255xf32>
    %c12 = arith.constant 12 : index
    %c1 = arith.constant 1 : index
    %27 = vector.load %arg8[%c12, %c1] : memref<36x256xf32, #tpu.memory_space<vmem>>, vector<4x255xf32>
    tpu.vector_store %arg8[%c12, %c1], %26 {strides = array<i32>} : memref<36x256xf32, #tpu.memory_space<vmem>>, vector<4x255xf32>,
    %cst_13 = arith.constant 0.000000e+00 : f32
    %28 = vector.broadcast %cst_13 : f32 to vector<4x1xf32>
    %c12_14 = arith.constant 12 : index
    %c0_15 = arith.constant 0 : index
    %29 = vector.load %arg8[%c12_14, %c0_15] : memref<36x256xf32, #tpu.memory_space<vmem>>, vector<4x1xf32>
    tpu.vector_store %arg8[%c12_14, %c0_15], %28 {strides = array<i32>} : memref<36x256xf32, #tpu.memory_space<vmem>>, vector<4x1xf32>,
    %c16_16 = arith.constant 16 : index
    %c0_17 = arith.constant 0 : index
    %30 = vector.load %arg8[%c16_16, %c0_17] : memref<36x256xf32, #tpu.memory_space<vmem>>, vector<4x256xf32>
    tpu.vector_store %arg8[%c16_16, %c0_17], %4 {strides = array<i32>} : memref<36x256xf32, #tpu.memory_space<vmem>>, vector<4x256xf32>,
    %31 = vector.extract_strided_slice %4 {offsets = [0, 1], sizes = [4, 255], strides = [1, 1]} : vector<4x256xf32> to vector<4x255xf32>
    %32 = vector.extract_strided_slice %2 {offsets = [0, 0], sizes = [1, 255], strides = [1, 1]} : vector<1x256xf32> to vector<1x255xf32>
    %33 = vector.broadcast %32 : vector<1x255xf32> to vector<4x255xf32>
    %34 = arith.mulf %31, %33 : vector<4x255xf32>
    %c20 = arith.constant 20 : index
    %c0_18 = arith.constant 0 : index
    %35 = vector.load %arg8[%c20, %c0_18] : memref<36x256xf32, #tpu.memory_space<vmem>>, vector<4x255xf32>
    tpu.vector_store %arg8[%c20, %c0_18], %34 {strides = array<i32>} : memref<36x256xf32, #tpu.memory_space<vmem>>, vector<4x255xf32>,
    %cst_19 = arith.constant 0.000000e+00 : f32
    %36 = vector.broadcast %cst_19 : f32 to vector<4x1xf32>
    %c20_20 = arith.constant 20 : index
    %c255 = arith.constant 255 : index
    %37 = vector.load %arg8[%c20_20, %c255] : memref<36x256xf32, #tpu.memory_space<vmem>>, vector<4x1xf32>
    tpu.vector_store %arg8[%c20_20, %c255], %36 {strides = array<i32>} : memref<36x256xf32, #tpu.memory_space<vmem>>, vector<4x1xf32>,
    %38 = vector.extract_strided_slice %4 {offsets = [0, 15], sizes = [4, 241], strides = [1, 1]} : vector<4x256xf32> to vector<4x241xf32>
    %39 = vector.extract_strided_slice %1 {offsets = [0, 0], sizes = [1, 241], strides = [1, 1]} : vector<1x256xf32> to vector<1x241xf32>
    %40 = vector.broadcast %39 : vector<1x241xf32> to vector<4x241xf32>
    %41 = arith.mulf %38, %40 : vector<4x241xf32>
    %c24 = arith.constant 24 : index
    %c0_21 = arith.constant 0 : index
    %42 = vector.load %arg8[%c24, %c0_21] : memref<36x256xf32, #tpu.memory_space<vmem>>, vector<4x241xf32>
    tpu.vector_store %arg8[%c24, %c0_21], %41 {strides = array<i32>} : memref<36x256xf32, #tpu.memory_space<vmem>>, vector<4x241xf32>,
    %cst_22 = arith.constant 0.000000e+00 : f32
    %43 = vector.broadcast %cst_22 : f32 to vector<4x15xf32>
    %c24_23 = arith.constant 24 : index
    %c241 = arith.constant 241 : index
    %44 = vector.load %arg8[%c24_23, %c241] : memref<36x256xf32, #tpu.memory_space<vmem>>, vector<4x15xf32>
    tpu.vector_store %arg8[%c24_23, %c241], %43 {strides = array<i32>} : memref<36x256xf32, #tpu.memory_space<vmem>>, vector<4x15xf32>,
    %45 = vector.extract_strided_slice %4 {offsets = [0, 16], sizes = [4, 240], strides = [1, 1]} : vector<4x256xf32> to vector<4x240xf32>
    %c28 = arith.constant 28 : index
    %c0_24 = arith.constant 0 : index
    %46 = vector.load %arg8[%c28, %c0_24] : memref<36x256xf32, #tpu.memory_space<vmem>>, vector<4x240xf32>
    tpu.vector_store %arg8[%c28, %c0_24], %45 {strides = array<i32>} : memref<36x256xf32, #tpu.memory_space<vmem>>, vector<4x240xf32>,
    %cst_25 = arith.constant 0.000000e+00 : f32
    %47 = vector.broadcast %cst_25 : f32 to vector<4x16xf32>
    %c28_26 = arith.constant 28 : index
    %c240 = arith.constant 240 : index
    %48 = vector.load %arg8[%c28_26, %c240] : memref<36x256xf32, #tpu.memory_space<vmem>>, vector<4x16xf32>
    tpu.vector_store %arg8[%c28_26, %c240], %47 {strides = array<i32>} : memref<36x256xf32, #tpu.memory_space<vmem>>, vector<4x16xf32>,
    %49 = vector.extract_strided_slice %4 {offsets = [0, 17], sizes = [4, 239], strides = [1, 1]} : vector<4x256xf32> to vector<4x239xf32>
    %50 = vector.extract_strided_slice %2 {offsets = [0, 0], sizes = [1, 239], strides = [1, 1]} : vector<1x256xf32> to vector<1x239xf32>
    %51 = vector.broadcast %50 : vector<1x239xf32> to vector<4x239xf32>
    %52 = arith.mulf %49, %51 : vector<4x239xf32>
    %c32 = arith.constant 32 : index
    %c0_27 = arith.constant 0 : index
    %53 = vector.load %arg8[%c32, %c0_27] : memref<36x256xf32, #tpu.memory_space<vmem>>, vector<4x239xf32>
    tpu.vector_store %arg8[%c32, %c0_27], %52 {strides = array<i32>} : memref<36x256xf32, #tpu.memory_space<vmem>>, vector<4x239xf32>,
    %cst_28 = arith.constant 0.000000e+00 : f32
    %54 = vector.broadcast %cst_28 : f32 to vector<4x17xf32>
    %c32_29 = arith.constant 32 : index
    %c239 = arith.constant 239 : index
    %55 = vector.load %arg8[%c32_29, %c239] : memref<36x256xf32, #tpu.memory_space<vmem>>, vector<4x17xf32>
    tpu.vector_store %arg8[%c32_29, %c239], %54 {strides = array<i32>} : memref<36x256xf32, #tpu.memory_space<vmem>>, vector<4x17xf32>,
    %c0_30 = arith.constant 0 : index
    %c0_31 = arith.constant 0 : index
    %56 = vector.load %arg3[%c0_30, %c0_31] : memref<8x36xf32, #tpu.memory_space<vmem>>, vector<8x36xf32>
    %c0_32 = arith.constant 0 : index
    %c0_33 = arith.constant 0 : index
    %57 = vector.load %arg8[%c0_32, %c0_33] : memref<36x256xf32, #tpu.memory_space<vmem>>, vector<36x256xf32>
    %cst_34 = arith.constant dense<0.000000e+00> : vector<8x256xf32>
    %58 = tpu.matmul %56, %57, %cst_34 {dimension_numbers = #tpu.dot_dimension_numbers<[1], [0], [0], [1], [0, 0, 1, 1], [], []>} : vector<8x36xf32>, vector<36x256xf32>, vector<8x256xf32> -> vector<8x256xf32>
    %c0_35 = arith.constant 0 : index
    %c0_36 = arith.constant 0 : index
    %59 = vector.load %arg4[%c0_35, %c0_36] : memref<8x1xf32, #tpu.memory_space<vmem>>, vector<8x1xf32>
    %60 = vector.broadcast %59 : vector<8x1xf32> to vector<8x256xf32>
    %61 = arith.addf %58, %60 : vector<8x256xf32>
    %cst_37 = arith.constant 0.000000e+00 : f32
    %62 = vector.broadcast %cst_37 : f32 to vector<8x256xf32>
    %63 = arith.maximumf %61, %62 : vector<8x256xf32>
    %64 = vector.extract_strided_slice %63 {offsets = [0, 0], sizes = [8, 239], strides = [1, 1]} : vector<8x256xf32> to vector<8x239xf32>
    %65 = vector.extract_strided_slice %1 {offsets = [0, 17], sizes = [1, 239], strides = [1, 1]} : vector<1x256xf32> to vector<1x239xf32>
    %66 = vector.broadcast %65 : vector<1x239xf32> to vector<8x239xf32>
    %67 = arith.mulf %64, %66 : vector<8x239xf32>
    %c0_38 = arith.constant 0 : index
    %c17_39 = arith.constant 17 : index
    %68 = vector.load %arg9[%c0_38, %c17_39] : memref<72x256xf32, #tpu.memory_space<vmem>>, vector<8x239xf32>
    tpu.vector_store %arg9[%c0_38, %c17_39], %67 {strides = array<i32>} : memref<72x256xf32, #tpu.memory_space<vmem>>, vector<8x239xf32>,
    %cst_40 = arith.constant 0.000000e+00 : f32
    %69 = vector.broadcast %cst_40 : f32 to vector<8x17xf32>
    %c0_41 = arith.constant 0 : index
    %c0_42 = arith.constant 0 : index
    %70 = vector.load %arg9[%c0_41, %c0_42] : memref<72x256xf32, #tpu.memory_space<vmem>>, vector<8x17xf32>
    tpu.vector_store %arg9[%c0_41, %c0_42], %69 {strides = array<i32>} : memref<72x256xf32, #tpu.memory_space<vmem>>, vector<8x17xf32>,
    %71 = vector.extract_strided_slice %63 {offsets = [0, 0], sizes = [8, 240], strides = [1, 1]} : vector<8x256xf32> to vector<8x240xf32>
    %c8_43 = arith.constant 8 : index
    %c16_44 = arith.constant 16 : index
    %72 = vector.load %arg9[%c8_43, %c16_44] : memref<72x256xf32, #tpu.memory_space<vmem>>, vector<8x240xf32>
    tpu.vector_store %arg9[%c8_43, %c16_44], %71 {strides = array<i32>} : memref<72x256xf32, #tpu.memory_space<vmem>>, vector<8x240xf32>,
    %cst_45 = arith.constant 0.000000e+00 : f32
    %73 = vector.broadcast %cst_45 : f32 to vector<8x16xf32>
    %c8_46 = arith.constant 8 : index
    %c0_47 = arith.constant 0 : index
    %74 = vector.load %arg9[%c8_46, %c0_47] : memref<72x256xf32, #tpu.memory_space<vmem>>, vector<8x16xf32>
    tpu.vector_store %arg9[%c8_46, %c0_47], %73 {strides = array<i32>} : memref<72x256xf32, #tpu.memory_space<vmem>>, vector<8x16xf32>,
    %75 = vector.extract_strided_slice %63 {offsets = [0, 0], sizes = [8, 241], strides = [1, 1]} : vector<8x256xf32> to vector<8x241xf32>
    %76 = vector.extract_strided_slice %2 {offsets = [0, 15], sizes = [1, 241], strides = [1, 1]} : vector<1x256xf32> to vector<1x241xf32>
    %77 = vector.broadcast %76 : vector<1x241xf32> to vector<8x241xf32>
    %78 = arith.mulf %75, %77 : vector<8x241xf32>
    %c16_48 = arith.constant 16 : index
    %c15_49 = arith.constant 15 : index
    %79 = vector.load %arg9[%c16_48, %c15_49] : memref<72x256xf32, #tpu.memory_space<vmem>>, vector<8x241xf32>
    tpu.vector_store %arg9[%c16_48, %c15_49], %78 {strides = array<i32>} : memref<72x256xf32, #tpu.memory_space<vmem>>, vector<8x241xf32>,
    %cst_50 = arith.constant 0.000000e+00 : f32
    %80 = vector.broadcast %cst_50 : f32 to vector<8x15xf32>
    %c16_51 = arith.constant 16 : index
    %c0_52 = arith.constant 0 : index
    %81 = vector.load %arg9[%c16_51, %c0_52] : memref<72x256xf32, #tpu.memory_space<vmem>>, vector<8x15xf32>
    tpu.vector_store %arg9[%c16_51, %c0_52], %80 {strides = array<i32>} : memref<72x256xf32, #tpu.memory_space<vmem>>, vector<8x15xf32>,
    %82 = vector.extract_strided_slice %63 {offsets = [0, 0], sizes = [8, 255], strides = [1, 1]} : vector<8x256xf32> to vector<8x255xf32>
    %83 = vector.extract_strided_slice %1 {offsets = [0, 1], sizes = [1, 255], strides = [1, 1]} : vector<1x256xf32> to vector<1x255xf32>
    %84 = vector.broadcast %83 : vector<1x255xf32> to vector<8x255xf32>
    %85 = arith.mulf %82, %84 : vector<8x255xf32>
    %c24_53 = arith.constant 24 : index
    %c1_54 = arith.constant 1 : index
    %86 = vector.load %arg9[%c24_53, %c1_54] : memref<72x256xf32, #tpu.memory_space<vmem>>, vector<8x255xf32>
    tpu.vector_store %arg9[%c24_53, %c1_54], %85 {strides = array<i32>} : memref<72x256xf32, #tpu.memory_space<vmem>>, vector<8x255xf32>,
    %cst_55 = arith.constant 0.000000e+00 : f32
    %87 = vector.broadcast %cst_55 : f32 to vector<8x1xf32>
    %c24_56 = arith.constant 24 : index
    %c0_57 = arith.constant 0 : index
    %88 = vector.load %arg9[%c24_56, %c0_57] : memref<72x256xf32, #tpu.memory_space<vmem>>, vector<8x1xf32>
    tpu.vector_store %arg9[%c24_56, %c0_57], %87 {strides = array<i32>} : memref<72x256xf32, #tpu.memory_space<vmem>>, vector<8x1xf32>,
    %c32_58 = arith.constant 32 : index
    %c0_59 = arith.constant 0 : index
    %89 = vector.load %arg9[%c32_58, %c0_59] : memref<72x256xf32, #tpu.memory_space<vmem>>, vector<8x256xf32>
    tpu.vector_store %arg9[%c32_58, %c0_59], %63 {strides = array<i32>} : memref<72x256xf32, #tpu.memory_space<vmem>>, vector<8x256xf32>,
    %90 = vector.extract_strided_slice %63 {offsets = [0, 1], sizes = [8, 255], strides = [1, 1]} : vector<8x256xf32> to vector<8x255xf32>
    %91 = vector.extract_strided_slice %2 {offsets = [0, 0], sizes = [1, 255], strides = [1, 1]} : vector<1x256xf32> to vector<1x255xf32>
    %92 = vector.broadcast %91 : vector<1x255xf32> to vector<8x255xf32>
    %93 = arith.mulf %90, %92 : vector<8x255xf32>
    %c40 = arith.constant 40 : index
    %c0_60 = arith.constant 0 : index
    %94 = vector.load %arg9[%c40, %c0_60] : memref<72x256xf32, #tpu.memory_space<vmem>>, vector<8x255xf32>
    tpu.vector_store %arg9[%c40, %c0_60], %93 {strides = array<i32>} : memref<72x256xf32, #tpu.memory_space<vmem>>, vector<8x255xf32>,
    %cst_61 = arith.constant 0.000000e+00 : f32
    %95 = vector.broadcast %cst_61 : f32 to vector<8x1xf32>
    %c40_62 = arith.constant 40 : index
    %c255_63 = arith.constant 255 : index
    %96 = vector.load %arg9[%c40_62, %c255_63] : memref<72x256xf32, #tpu.memory_space<vmem>>, vector<8x1xf32>
    tpu.vector_store %arg9[%c40_62, %c255_63], %95 {strides = array<i32>} : memref<72x256xf32, #tpu.memory_space<vmem>>, vector<8x1xf32>,
    %97 = vector.extract_strided_slice %63 {offsets = [0, 15], sizes = [8, 241], strides = [1, 1]} : vector<8x256xf32> to vector<8x241xf32>
    %98 = vector.extract_strided_slice %1 {offsets = [0, 0], sizes = [1, 241], strides = [1, 1]} : vector<1x256xf32> to vector<1x241xf32>
    %99 = vector.broadcast %98 : vector<1x241xf32> to vector<8x241xf32>
    %100 = arith.mulf %97, %99 : vector<8x241xf32>
    %c48 = arith.constant 48 : index
    %c0_64 = arith.constant 0 : index
    %101 = vector.load %arg9[%c48, %c0_64] : memref<72x256xf32, #tpu.memory_space<vmem>>, vector<8x241xf32>
    tpu.vector_store %arg9[%c48, %c0_64], %100 {strides = array<i32>} : memref<72x256xf32, #tpu.memory_space<vmem>>, vector<8x241xf32>,
    %cst_65 = arith.constant 0.000000e+00 : f32
    %102 = vector.broadcast %cst_65 : f32 to vector<8x15xf32>
    %c48_66 = arith.constant 48 : index
    %c241_67 = arith.constant 241 : index
    %103 = vector.load %arg9[%c48_66, %c241_67] : memref<72x256xf32, #tpu.memory_space<vmem>>, vector<8x15xf32>
    tpu.vector_store %arg9[%c48_66, %c241_67], %102 {strides = array<i32>} : memref<72x256xf32, #tpu.memory_space<vmem>>, vector<8x15xf32>,
    %104 = vector.extract_strided_slice %63 {offsets = [0, 16], sizes = [8, 240], strides = [1, 1]} : vector<8x256xf32> to vector<8x240xf32>
    %c56 = arith.constant 56 : index
    %c0_68 = arith.constant 0 : index
    %105 = vector.load %arg9[%c56, %c0_68] : memref<72x256xf32, #tpu.memory_space<vmem>>, vector<8x240xf32>
    tpu.vector_store %arg9[%c56, %c0_68], %104 {strides = array<i32>} : memref<72x256xf32, #tpu.memory_space<vmem>>, vector<8x240xf32>,
    %cst_69 = arith.constant 0.000000e+00 : f32
    %106 = vector.broadcast %cst_69 : f32 to vector<8x16xf32>
    %c56_70 = arith.constant 56 : index
    %c240_71 = arith.constant 240 : index
    %107 = vector.load %arg9[%c56_70, %c240_71] : memref<72x256xf32, #tpu.memory_space<vmem>>, vector<8x16xf32>
    tpu.vector_store %arg9[%c56_70, %c240_71], %106 {strides = array<i32>} : memref<72x256xf32, #tpu.memory_space<vmem>>, vector<8x16xf32>,
    %108 = vector.extract_strided_slice %63 {offsets = [0, 17], sizes = [8, 239], strides = [1, 1]} : vector<8x256xf32> to vector<8x239xf32>
    %109 = vector.extract_strided_slice %2 {offsets = [0, 0], sizes = [1, 239], strides = [1, 1]} : vector<1x256xf32> to vector<1x239xf32>
    %110 = vector.broadcast %109 : vector<1x239xf32> to vector<8x239xf32>
    %111 = arith.mulf %108, %110 : vector<8x239xf32>
    %c64 = arith.constant 64 : index
    %c0_72 = arith.constant 0 : index
    %112 = vector.load %arg9[%c64, %c0_72] : memref<72x256xf32, #tpu.memory_space<vmem>>, vector<8x239xf32>
    tpu.vector_store %arg9[%c64, %c0_72], %111 {strides = array<i32>} : memref<72x256xf32, #tpu.memory_space<vmem>>, vector<8x239xf32>,
    %cst_73 = arith.constant 0.000000e+00 : f32
    %113 = vector.broadcast %cst_73 : f32 to vector<8x17xf32>
    %c64_74 = arith.constant 64 : index
    %c239_75 = arith.constant 239 : index
    %114 = vector.load %arg9[%c64_74, %c239_75] : memref<72x256xf32, #tpu.memory_space<vmem>>, vector<8x17xf32>
    tpu.vector_store %arg9[%c64_74, %c239_75], %113 {strides = array<i32>} : memref<72x256xf32, #tpu.memory_space<vmem>>, vector<8x17xf32>,
    %c0_76 = arith.constant 0 : index
    %c0_77 = arith.constant 0 : index
    %115 = vector.load %arg5[%c0_76, %c0_77] : memref<8x72xf32, #tpu.memory_space<vmem>>, vector<8x72xf32>
    %c0_78 = arith.constant 0 : index
    %c0_79 = arith.constant 0 : index
    %116 = vector.load %arg9[%c0_78, %c0_79] : memref<72x256xf32, #tpu.memory_space<vmem>>, vector<72x256xf32>
    %cst_80 = arith.constant dense<0.000000e+00> : vector<8x256xf32>
    %117 = tpu.matmul %115, %116, %cst_80 {dimension_numbers = #tpu.dot_dimension_numbers<[1], [0], [0], [1], [0, 0, 1, 1], [], []>} : vector<8x72xf32>, vector<72x256xf32>, vector<8x256xf32> -> vector<8x256xf32>
    %c0_81 = arith.constant 0 : index
    %c0_82 = arith.constant 0 : index
    %118 = vector.load %arg6[%c0_81, %c0_82] : memref<8x1xf32, #tpu.memory_space<vmem>>, vector<8x1xf32>
    %119 = vector.broadcast %118 : vector<8x1xf32> to vector<8x256xf32>
    %120 = arith.addf %117, %119 : vector<8x256xf32>
    %cst_83 = arith.constant 0.000000e+00 : f32
    %121 = vector.broadcast %cst_83 : f32 to vector<8x256xf32>
    %122 = arith.maximumf %120, %121 : vector<8x256xf32>
    %c0_84 = arith.constant 0 : index
    %c0_85 = arith.constant 0 : index
    %c0_86 = arith.constant 0 : index
    %123 = vector.load %arg7[%c0_84, %c0_85, %c0_86] : memref<1x8x256xf32, #tpu.memory_space<vmem>>, vector<1x8x256xf32>
    %124 = vector.shape_cast %123 : vector<1x8x256xf32> to vector<8x256xf32>
    %125 = vector.shape_cast %122 : vector<8x256xf32> to vector<1x8x256xf32>
    tpu.vector_store %arg7[%c0_84, %c0_85, %c0_86], %125 {strides = array<i32>} : memref<1x8x256xf32, #tpu.memory_space<vmem>>, vector<1x8x256xf32>,
    return
  }
  func.func @transform_0(%arg0: i32) -> (i32, i32, i32) {
    %c0_i32 = arith.constant 0 : i32
    %c0_i32_0 = arith.constant 0 : i32
    %c0_i32_1 = arith.constant 0 : i32
    return %arg0, %c0_i32, %c0_i32_0 : i32, i32, i32
  }
  func.func @transform_1(%arg0: i32) -> (i32, i32) {
    %c0_i32 = arith.constant 0 : i32
    %c0_i32_0 = arith.constant 0 : i32
    %c0_i32_1 = arith.constant 0 : i32
    return %c0_i32, %c0_i32_0 : i32, i32
  }
  func.func @transform_2(%arg0: i32) -> (i32, i32) {
    %c0_i32 = arith.constant 0 : i32
    %c0_i32_0 = arith.constant 0 : i32
    %c0_i32_1 = arith.constant 0 : i32
    return %c0_i32, %c0_i32_0 : i32, i32
  }
  func.func @transform_3(%arg0: i32) -> (i32, i32) {
    %c0_i32 = arith.constant 0 : i32
    %c0_i32_0 = arith.constant 0 : i32
    %c0_i32_1 = arith.constant 0 : i32
    return %c0_i32, %c0_i32_0 : i32, i32
  }
  func.func @transform_4(%arg0: i32) -> (i32, i32) {
    %c0_i32 = arith.constant 0 : i32
    %c0_i32_0 = arith.constant 0 : i32
    %c0_i32_1 = arith.constant 0 : i32
    return %c0_i32, %c0_i32_0 : i32, i32
  }
  func.func @transform_5(%arg0: i32) -> (i32, i32) {
    %c0_i32 = arith.constant 0 : i32
    %c0_i32_0 = arith.constant 0 : i32
    %c0_i32_1 = arith.constant 0 : i32
    return %c0_i32, %c0_i32_0 : i32, i32
  }
  func.func @transform_6(%arg0: i32) -> (i32, i32, i32) {
    %c0_i32 = arith.constant 0 : i32
    %c0_i32_0 = arith.constant 0 : i32
    %c0_i32_1 = arith.constant 0 : i32
    return %arg0, %c0_i32, %c0_i32_0 : i32, i32, i32
  }
}

</mosaic_0001>

<bundles_post_ra>
// kernel: tpu_custom_call.1
= control target key start
LH: loop header
LB: loop body
LE: loop exit
PB: predicated region body
PF: predicated region fallthrough
CT: control target
= control target key end

     0   :  { %11 = vsyncpa [#allocation5], 0  ;;  %s1503_s0 = inlined_call_operand.vmem [shape: f32[2,4,256], index: 0, kind: input, shape index: {}]   ;;  %s1504_s1 = inlined_call_operand.hbm [shape: f32[2,256], index: 1, kind: input, shape index: {}]   ;;  %s1505_s2 = inlined_call_operand.hbm [shape: f32[8,36], index: 2, kind: input, shape index: {}]   ;;  %s1506_s3 = inlined_call_operand.vmem [shape: f32[8,1], index: 3, kind: input, shape index: {}]   ;;  %s1507_s4 = inlined_call_operand.hbm [shape: f32[8,72], index: 4, kind: input, shape index: {}]   ;;  %s1508_s5 = inlined_call_operand.vmem [shape: f32[8,1], index: 5, kind: input, shape index: {}]   ;;  %s1509_s6 = inlined_call_operand.hbm [shape: f32[2,8,256], index: 6, kind: output, shape index: {}]  }
   0x1   :  { %12 = vsyncpa [#allocation8], 0 }
   0x2   :  { %13 = vsyncpa [#allocation6], 0 }
   0x3   :  { %15 = vsyncpa [#allocation6 + $0x1], 0  ;;  %s1225_s21 = smov 0   ;;  %s1227_s22 = smov 0  }
   0x4   :  { %s1229_s23 = smov 0   ;;  %s1231_s24 = smov 0  }
   0x5 LB: > { %s1246_s25 = sadd.s32 4294967295, %s1175_s24   ;;  %s907_s26 = sadd.s32 4294967294, %s1175_s24   ;;  %s1175_s24 = sphi %s1231_s24, %s1516_s24   ;;  %s1171_s23 = sphi %s1229_s23, %s1515_s23   ;;  %s1167_s22 = sphi %s1227_s22, %s1514_s22   ;;  %s1163_s21 = sphi %s1225_s21, %s1513_s21  }
   0x6   : > { %s1250_s27 = sadd.s32 1, %s1175_s24   ;;  %s159_s28 = sadd.s32 1, %s1171_s23 }
   0x7   : > { %s156_s29 = ssub.s32 %s1175_s24, %s1250_s27  ;;  %p169_p0 = scmp.ne.s32.totalorder %s1171_s23, %s1167_s22 }
   0x8   : > { %p157_p1 = scmp.eq.s32.totalorder %s156_s29, 0  ;;  %p170_p2 = scmp.eq.s32.totalorder %s1246_s25, 1 }
   0x9   : > { %p175_p3 = scmp.ne.s32.totalorder %s1167_s22, %s1163_s21  ;;  %p176_p4 = scmp.eq.s32.totalorder %s907_s26, 1 }
   0xa   : > { %s1261_s30 = scalar_select %p157_p1, %s1171_s23, %s159_s28  }
   0xb   : > { %p1263_p5 = por %p170_p2, %p169_p0  ;;  %p1267_p6 = por %p176_p4, %p175_p3 }
   0xc   : > { %p908_p7 = scmp.ge.s32.totalorder %s1175_s24, 1  ;;  %p183_p8 = scmp.lt.s32.totalorder %s1175_s24, 3 }
   0xd   : > { %p961_p9 = scmp.eq.s32.totalorder %s1246_s25, 0  ;;  %s207_s12 = sshll.u32 %s1505_s2, 4  ;;  %s208_s12 = int_to_ptr.hbm [resolvable:$true] %s207_s12 }
   0xe   : > { %p1274_p10 = pnand %p908_p7, %p183_p8  ;;  %s1177_s13 = smov [#allocation7]  }
   0xf   : > { %s209_s14 = sshll.u32 %s1177_s13, 4  ;;  %s195_s17 = sshll.u32 %s1504_s1, 4  ;;  %s210_s14 = int_to_ptr.vmem [resolvable:$true] %s209_s14  ;;  %s196_s17 = int_to_ptr.hbm [resolvable:$true] %s195_s17 }
  0x10   : > { %p947_p11 = pneg %p1274_p10  ;;  %s222_s20 = sshll.u32 %s1507_s4, 4  ;;  %s223_s20 = int_to_ptr.hbm [resolvable:$true] %s222_s20 }
  0x11   : > { %s1178_s26 = smov [#allocation4]   ;;  %s1179_s29 = smov [#allocation9]  }
  0x12   : > { %p948_p12 = pnand %p961_p9, %p947_p11  ;;  %s197_s28 = sshll.u32 %s1178_s26, 4  ;;  %s198_s28 = int_to_ptr.vmem [resolvable:$true] %s197_s28 }
  0x13   : > { %s224_s10 = sshll.u32 %s1179_s29, 4  ;;  %248 = sbr.rel (%p1274_p10) target bundleno = 787 (0x313), region = 44  ;;  %s225_s10 = int_to_ptr.vmem [resolvable:$true] %s224_s10 }
  0x14   : > { %953 = dma.hbm_to_vmem [thread:$0]  (!%p948_p12), %s208_s12, 128, %s210_s14, [#allocation8]  }
  0x15   : > { %950 = dma.hbm_to_vmem [thread:$0]  (!%p948_p12), %s196_s17, 64, %s198_s28, [#allocation5]  }
  0x16   : > { %956 = dma.hbm_to_vmem [thread:$0]  (!%p948_p12), %s223_s20, 128, %s225_s10, [#allocation8]  }
  0x18   : > { %1150 = dma.done.wait (%p961_p9), [#allocation5], 64  }
  0x19   : > { %1152 = vsyncadd (%p961_p9), [#allocation5], 4294967232 }
  0x1a   : > { %1154 = dma.done.wait (%p961_p9), [#allocation8], 256  }
  0x1b   : > { %1156 = vsyncadd (%p961_p9), [#allocation8], 4294967040  ;;  %v294_v0 = vld [vmem:[#allocation4] sm:$0xf]  ;;  %vm306_vm0 = vcmask 1043456   ;;  %s1180_s9 = smov 111  }
  0x1c   : > { %v297_v1 = vperm.slane %v294_v0, 0  ;;  %v298_v2 = vperm.slane %v294_v0, 2  ;;  %v351_v3 = vperm.slane %v294_v0, 3  ;;  %v350_v7 = vperm.slane %v294_v0, 1  ;;  %s1181_s11 = smov 127   ;;  %s1182_s12 = smov 15  }
  0x1d   : > { %s1183_s13 = smov 113   ;;  %s1184_s14 = smov 1   ;;  %vm311_vm1 = vcmask 908288   ;;  %vm363_vm2 = vcmask 924672   ;;  %vm387_vm3 = vcmask 1039360   ;;  %vm400_vm4 = vcmask 7168  }
  0x1e   : > { %v1301_v4 = vperm.slane %v297_v1, 0  ;;  %v1303_v5 = vperm.slane %v298_v2, 0  ;;  %v1306_v8 = vperm.slane %v351_v3, 1  ;;  %v1312_v10 = vperm.slane %v350_v7, 1  ;;  %s1185_s15 = smov 17   ;;  %p289_p13 = scmp.lt.s32.totalorder %s1246_s25, 1 }
  0x1f   : > { %vm375_vm5 = vcmask 121856   ;;  %vm323_vm6 = vcmask 138240   ;;  %s1186_s26 = smov 112   ;;  %s1187_s28 = smov 16   ;;  %vm379_vm7 = vcmask 1043576   ;;  %vm382_vm8 = vcmask 117760  }
  0x20   : > { %v305_v6 = vrot.slane %v1303_v5, 4  ;;  %v358_v11 = vrot.slane %v1306_v8, 4  ;;  %s290_s16 = scalar_select %p289_p13, %s1246_s25, 1  ;;  %v1188_v57 = vmov 0.0   ;;  %vm327_vm9 = vcmask 1043592   ;;  %v511_v3 = vld [vmem:[%s1506_s3] sm:$0xff] }
  0x21   : > { %vm330_vm10 = vcmask 134144   ;;  %vm404_vm11 = vcmask 1047564   ;;  %vm407_vm12 = vcmask 7172   ;;  %v1189_v1 = vmov 0  }
  0x22   : > { %v307_v9 = vsel %vm306_vm0, %v1301_v4, %v305_v6  ;;  %v359_v12 = vsel %vm306_vm0, %v1312_v10, %v358_v11  ;;  %s931_s17 = sshll.u32 %s290_s16, 3  ;;  %1013 = vset.pattern.permute.xlu1 %v1189_v1  ;;  %1014 = vset.pattern.permute.xlu0 %v1189_v1  ;;  %vm474_vm13 = vcmask 916484   ;;  %vm476_vm14 = vcmask 1048452  }
  0x23   : > { %308 = vrot.lane.b32.xlu0 %v307_v9, %s1180_s9  ;;  %384 = vrot.lane.b32.xlu1 %v307_v9, %s1181_s11  ;;  %s293_s20 = scalar_lea.vmem %s1503_s0, %s931_s17  ;;  %vm435_vm15 = vcmask 1039364  }
  0x24   : > { %439 = vrot.lane.b32.xlu2 %v307_v9, %s1182_s12  ;;  %v295_v14 = vld [vmem:[%s293_s20] sm:$0xff] }
  0x2b   : > { %360 = vrot.lane.b32.xlu0 %v359_v12, %s1183_s13  ;;  %416 = vrot.lane.b32.xlu1 %v359_v12, %s1184_s14 }
  0x2c   : > { %478 = vrot.lane.b32.xlu2 %v359_v12, %s1185_s15 }
  0x7e   : > { %v440_v37 = vpop.permute.xlu2 %439 }
  0x7f   : > { %v441_v39 = vrot.slane %v440_v37, 4 }
  0x81   : > { %v442_v42 = vsel %vm375_vm5, %v441_v39, %v440_v37 }
  0x82   : > { %v444_v43 = vmul.f32 %v442_v42, %v295_v14 }
  0x86   : > { %v479_v46 = vpop.permute.xlu2 %478 }
  0x87   : > { %v480_v47 = vrot.slane %v479_v46, 4 }
  0x89   : > { %v481_v50 = vsel %vm323_vm6, %v480_v47, %v479_v46 }
  0x8a   : > { %v483_v51 = vmul.f32 %v481_v50, %v295_v14 }
  0x95   : > { %v309_v13 = vpop.permute.xlu0 %308  ;;  %v385_v23 = vpop.permute.xlu1 %384 }
  0x96   : > { %v310_v15 = vrot.slane %v309_v13, 4  ;;  %v386_v25 = vrot.slane %v385_v23, 4 }
  0x98   : > { %v312_v16 = vsel %vm311_vm1, %v309_v13, %v310_v15  ;;  %v388_v28 = vsel %vm387_vm3, %v385_v23, %v386_v25 }
  0x99   : > { %v314_v17 = vmul.f32 %v312_v16, %v295_v14  ;;  %v390_v29 = vmul.f32 %v388_v28, %v295_v14  ;;  %v500_v28 = vld [vmem:[#allocation7] sm:$0xff] }
  0x9b   : > { %316 = vst [vmem:[#allocation1] ss:$2 sm:$0xff] %v314_v17 }
  0x9d   : > { %v361_v18 = vpop.permute.xlu0 %360  ;;  %v417_v32 = vpop.permute.xlu1 %416 }
  0x9e   : > { %v362_v19 = vrot.slane %v361_v18, 4  ;;  %v418_v33 = vrot.slane %v417_v32, 4 }
  0xa0   : > { %v364_v22 = vsel %vm363_vm2, %v361_v18, %v362_v19  ;;  %v419_v36 = vsel %vm400_vm4, %v418_v33, %v417_v32 }
  0xa1   : > { %v366_v24 = vmul.f32 %v364_v22, %v295_v14  ;;  %v421_v38 = vmul.f32 %v419_v36, %v295_v14 }
  0xa2   : > { %v1327_v20 = vld.sshfl [vmem:[#allocation1 + $0x8] sm:$0xff pattern:$0x75316420]  ;;  %v317_v21 = vld.sshfl [vmem:[#allocation1] sm:$0xff pattern:$0x75316420] }
  0xa3   : > { %319 = vrot.lane.b32.xlu0 %v317_v21, %s1185_s15  ;;  %334 = vst [vmem:[#allocation1 + $0x1] ss:$2 sm:$0xff] %v295_v14 }
  0xaa   : > { %v335_v26 = vld.sshfl [vmem:[#allocation1] sm:$0xff pattern:$0x75316420]  ;;  %v336_v27 = vld.sshfl [vmem:[#allocation1 + $0x8] sm:$0xff pattern:$0x75316420] }
  0xab   : > { %368 = vst [vmem:[#allocation1] ss:$2 sm:$0xff] %v366_v24 }
  0xb2   : > { %v370_v30 = vld.sshfl [vmem:[#allocation1 + $0x8] sm:$0xff pattern:$0x75316420]  ;;  %v369_v31 = vld.sshfl [vmem:[#allocation1] sm:$0xff pattern:$0x75316420] }
  0xb3   : > { %373 = vrot.lane.b32.xlu0 %v370_v30, %s1182_s12  ;;  %371 = vrot.lane.b32.xlu2 %v369_v31, %s1182_s12  ;;  %393 = vst [vmem:[#allocation1 + $0x1] ss:$2 sm:$0xff] %v390_v29 }
  0xba   : > { %v395_v34 = vld.sshfl [vmem:[#allocation1 + $0x8] sm:$0xff pattern:$0x75316420]  ;;  %v394_v35 = vld.sshfl [vmem:[#allocation1] sm:$0xff pattern:$0x75316420] }
  0xbb   : > { %398 = vrot.lane.b32.xlu2 %v395_v34, %s1184_s14  ;;  %396 = vrot.lane.b32.xlu1 %v394_v35, %s1184_s14  ;;  %409 = vst [vmem:[#allocation1] ss:$2 sm:$0xff] %v295_v14 }
  0xc2   : > { %v410_v40 = vld.sshfl [vmem:[#allocation1] sm:$0xff pattern:$0x75316420]  ;;  %v411_v41 = vld.sshfl [vmem:[#allocation1 + $0x8] sm:$0xff pattern:$0x75316420] }
  0xc3   : > { %424 = vst [vmem:[#allocation1 + $0x1] ss:$2 sm:$0xff] %v421_v38 }
  0xc4   : > { %414 = vst [vmem:[#allocation2 + $0x20] sm:$0xf] %v410_v40 }
  0xc5   : > { %415 = vst [vmem:[#allocation2 + $0x28] sm:$0xf] %v411_v41 }
  0xca   : > { %v426_v44 = vld.sshfl [vmem:[#allocation1 + $0x8] sm:$0xff pattern:$0x75316420]  ;;  %v425_v45 = vld.sshfl [vmem:[#allocation1] sm:$0xff pattern:$0x75316420] }
  0xcb   : > { %429 = vrot.lane.b32.xlu1 %v426_v44, %s1181_s11  ;;  %427 = vrot.lane.b32.xlu0 %v425_v45, %s1181_s11  ;;  %446 = vst [vmem:[#allocation1] ss:$2 sm:$0xff] %v444_v43 }
  0xd2   : > { %v448_v48 = vld.sshfl [vmem:[#allocation1 + $0x8] sm:$0xff pattern:$0x75316420]  ;;  %v447_v49 = vld.sshfl [vmem:[#allocation1] sm:$0xff pattern:$0x75316420] }
  0xd3   : > { %451 = vrot.lane.b32.xlu0 %v448_v48, %s1183_s13  ;;  %449 = vrot.lane.b32.xlu2 %v447_v49, %s1183_s13  ;;  %462 = vst [vmem:[#allocation1 + $0x1] ss:$2 sm:$0xff] %v295_v14 }
  0xda   : > { %v464_v52 = vld.sshfl [vmem:[#allocation1 + $0x8] sm:$0xff pattern:$0x75316420]  ;;  %v463_v53 = vld.sshfl [vmem:[#allocation1] sm:$0xff pattern:$0x75316420] }
  0xdb   : > { %467 = vrot.lane.b32.xlu2 %v464_v52, %s1186_s26  ;;  %465 = vrot.lane.b32.xlu1 %v463_v53, %s1186_s26  ;;  %485 = vst [vmem:[#allocation1] ss:$2 sm:$0xff] %v483_v51 }
  0xe2   : > { %v487_v54 = vld.sshfl [vmem:[#allocation1 + $0x8] sm:$0xff pattern:$0x75316420]  ;;  %v486_v55 = vld.sshfl [vmem:[#allocation1] sm:$0xff pattern:$0x75316420] }
  0xe3   : > { %337 = vrot.lane.b32.xlu2 %v335_v26, %s1187_s28  ;;  %490 = vrot.lane.b32.xlu1 %v487_v54, %s1180_s9 }
  0xe4   : > { %488 = vrot.lane.b32.xlu0 %v486_v55, %s1180_s9 }
  0xeb   : > { %321 = vrot.lane.b32.xlu1 %v1327_v20, %s1185_s15  ;;  %705 = vrot.lane.b32.xlu2 %v1312_v10, %s1185_s15 }
  0xec   : > { %339 = vrot.lane.b32.xlu0 %v336_v27, %s1187_s28 }
  0xf3   : > { %674 = vrot.lane.b32.xlu2 %v1303_v5, %s1182_s12  ;;  %514 = vperm.xlu1 %1013, %v511_v3  }
  0xf4   : > { %707 = vrot.lane.b32.xlu0 %v1306_v8, %s1185_s15 }
  0xfb   : > { %626 = vrot.lane.b32.xlu2 %v1301_v4, %s1181_s11  ;;  %672 = vrot.lane.b32.xlu1 %v1301_v4, %s1182_s12 }
  0xfc   : > { %650 = vrot.lane.b32.xlu0 %v1312_v10, %s1184_s14 }
 0x103   : > { %606 = vrot.lane.b32.xlu2 %v1306_v8, %s1183_s13  ;;  %652 = vrot.lane.b32.xlu1 %v1306_v8, %s1184_s14 }
 0x104   : > { %628 = vrot.lane.b32.xlu0 %v1303_v5, %s1181_s11 }
 0x10b   : > { %604 = vrot.lane.b32.xlu1 %v1312_v10, %s1183_s13 }
 0x10c   : > { %569 = vrot.lane.b32.xlu0 %v1301_v4, %s1180_s9 }
 0x10d   : > { %v372_v56 = vpop.permute.xlu2 %371 }
 0x10e   : > { %380 = vst.msk [vmem:[#allocation2 + $0x10] sm:$0xf] %vm379_vm7, %v372_v56  ;;  %vm437_vm7 = vcmask 1048572  }
 0x10f   : > { %383 = vst.msk [vmem:[#allocation2 + $0x10] sm:$0xf] %vm382_vm8, %v1188_v57  ;;  %vm345_vm8 = vcmask 1047684  }
 0x113   : > { %571 = vrot.lane.b32.xlu1 %v1303_v5, %s1180_s9 }
 0x115   : > { %v1368_v58 = vpop.permute.xlu0 %319  ;;  %v399_v59 = vpop.permute.xlu2 %398 }
 0x116   : > { %328 = vst.msk [vmem:[#allocation2] sm:$0xf] %vm327_vm9, %v1368_v58  ;;  %vm348_vm9 = vcmask 130052  }
 0x117   : > { %331 = vst.msk [vmem:[#allocation2] sm:$0xf] %vm330_vm10, %v1188_v57  ;;  %vm457_vm10 = vcmask 920576  }
 0x125   : > { %v374_v60 = vpop.permute.xlu0 %373 }
 0x126   : > { %v376_v61 = vsel %vm375_vm5, %v372_v56, %v374_v60 }
 0x127   : > { %381 = vst [vmem:[#allocation2 + $0x18] sm:$0xf] %v376_v61 }
 0x12d   : > { %v397_v62 = vpop.permute.xlu1 %396  ;;  %v450_v63 = vpop.permute.xlu2 %449 }
 0x12e   : > { %v401_v0 = vsel %vm400_vm4, %v397_v62, %v399_v59  ;;  %405 = vst.msk [vmem:[#allocation2 + $0x10] sm:$0xf0] %vm404_vm11, %v397_v62  ;;  %vm459_vm11 = vcmask 1044360  }
 0x12f   : > { %406 = vst [vmem:[#allocation2 + $0x18] sm:$0xf0] %v401_v0 }
 0x130   : > { %408 = vst.msk [vmem:[#allocation2 + $0x10] sm:$0xf0] %vm407_vm12, %v1188_v57  ;;  %vm469_vm12 = vcmask 916480  }
 0x135   : > { %v468_v2 = vpop.permute.xlu2 %467 }
 0x136   : > { %475 = vst.msk [vmem:[#allocation2 + $0x38] sm:$0xf0] %vm474_vm13, %v468_v2  ;;  %vm496_vm13 = vcmask 904192   ;;  %v504_v26 = vld [vmem:[#allocation2 + $0x18] sm:$0xff] }
 0x137   : > { %477 = vst.msk [vmem:[#allocation2 + $0x38] sm:$0xf0] %vm476_vm14, %v1188_v57  ;;  %vm498_vm14 = vcmask 1044344   ;;  %v503_v25 = vld [vmem:[#allocation2 + $0x10] sm:$0xff] }
 0x13d   : > { %v430_v6 = vpop.permute.xlu1 %429  ;;  %v338_v7 = vpop.permute.xlu2 %337 }
 0x13e   : > { %436 = vst.msk [vmem:[#allocation2 + $0x28] sm:$0xf0] %vm435_vm15, %v430_v6  ;;  %v428_v9 = vpop.permute.xlu0 %427  ;;  %vm341_vm15 = vcmask 130048  }
 0x13f   : > { %438 = vst.msk [vmem:[#allocation2 + $0x28] sm:$0xf0] %vm437_vm7, %v1188_v57  ;;  %v431_v11 = vsel %vm387_vm3, %v428_v9, %v430_v6  ;;  %vm517_vm7 = vcmask 293888  }
 0x140   : > { %346 = vst.msk [vmem:[#allocation2] sm:$0xf0] %vm345_vm8, %v338_v7  ;;  %vm600_vm8 = vcmask 1047680  }
 0x141   : > { %349 = vst.msk [vmem:[#allocation2] sm:$0xf0] %vm348_vm9, %v1188_v57  ;;  %vm725_vm9 = vcmask 1048440  }
 0x142   : > { %434 = vst [vmem:[#allocation2 + $0x20] sm:$0xf0] %v431_v11 }
 0x145   : > { %v706_v31 = vpop.permute.xlu2 %705 }
 0x146   : > { %v452_v12 = vpop.permute.xlu0 %451  ;;  %v506_v5 = vld [vmem:[#allocation2 + $0x28] sm:$0xff] }
 0x147   : > { %v453_v13 = vsel %vm363_vm2, %v450_v63, %v452_v12  ;;  %458 = vst.msk [vmem:[#allocation2 + $0x38] sm:$0xf] %vm457_vm10, %v452_v12  ;;  %vm692_vm10 = vcmask 1048456  }
 0x148   : > { %456 = vst [vmem:[#allocation2 + $0x30] sm:$0xf] %v453_v13  ;;  %v501_v27 = vld [vmem:[#allocation2] sm:$0xff] }
 0x149   : > { %460 = vst.msk [vmem:[#allocation2 + $0x38] sm:$0xf] %vm459_vm11, %v1188_v57  ;;  %v505_v24 = vld [vmem:[#allocation2 + $0x20] sm:$0xff]  ;;  %vm622_vm11 = vcmask 1047672  }
 0x14d   : > { %v466_v14 = vpop.permute.xlu1 %465  ;;  %v675_v40 = vpop.permute.xlu2 %674 }
 0x14e   : > { %v470_v15 = vsel %vm469_vm12, %v466_v14, %v468_v2 }
 0x14f   : > { %473 = vst [vmem:[#allocation2 + $0x30] sm:$0xf0] %v470_v15 }
 0x150   : > { %v508_v20 = vld [vmem:[#allocation2 + $0x38] sm:$0xff] }
 0x155   : > { %v491_v4 = vpop.permute.xlu1 %490  ;;  %v627_v47 = vpop.permute.xlu2 %626 }
 0x156   : > { %497 = vst.msk [vmem:[#allocation2 + $0x48] sm:$0xf] %vm496_vm13, %v491_v4  ;;  %v489_v16 = vpop.permute.xlu0 %488  ;;  %v507_v23 = vld [vmem:[#allocation2 + $0x30] sm:$0xff] }
 0x157   : > { %499 = vst.msk [vmem:[#allocation2 + $0x48] sm:$0xf] %vm498_vm14, %v1188_v57  ;;  %v492_v17 = vsel %vm311_vm1, %v489_v16, %v491_v4 }
 0x158   : > { %495 = vst [vmem:[#allocation2 + $0x40] sm:$0xf] %v492_v17 }
 0x15d   : > { %v322_v8 = vpop.permute.xlu1 %321  ;;  %v607_v56 = vpop.permute.xlu2 %606 }
 0x15e   : > { %v324_v18 = vsel %vm323_vm6, %v1368_v58, %v322_v8  ;;  %v340_v19 = vpop.permute.xlu0 %339  ;;  %v510_v10 = vld [vmem:[#allocation2 + $0x48] sm:$0xf] }
 0x15f   : > { %329 = vst [vmem:[#allocation2 + $0x8] sm:$0xf] %v324_v18  ;;  %v342_v21 = vsel %vm341_vm15, %v338_v7, %v340_v19  ;;  %v509_v22 = vld [vmem:[#allocation2 + $0x40] sm:$0xf]  ;;  %922 = vmatpush.msk.msra.mxu1 %vm306_vm0, %v510_v10  ;;  %v746_v19 = vld [vmem:[%s1508_s5] sm:$0xff] }
 0x160   : > { %347 = vst [vmem:[#allocation2 + $0x8] sm:$0xf0] %v342_v21  ;;  %920 = vmatpush.msk.msra.mxu0 %vm306_vm0, %v509_v22  ;;  %vm703_vm0 = vcmask 1048448  }
 0x161   : > { %559 = vmatpush.msra.mxu1 %v508_v20 }
 0x162   : > { %539 = vmatpush.msra.mxu0 %v507_v23 }
 0x163   : > { %560 = vmatpush.msra.mxu1 %v506_v5 }
 0x164   : > { %540 = vmatpush.msra.mxu0 %v505_v24 }
 0x165   : > { %561 = vmatpush.msra.mxu1 %v504_v26  ;;  %v515_v30 = vpop.permute.xlu1 %514 }
 0x166   : > { %541 = vmatpush.msra.mxu0 %v503_v25  ;;  %v708_v32 = vpop.permute.xlu0 %707 }
 0x167   : > { %v502_v29 = vld [vmem:[#allocation2 + $0x8] sm:$0xff]  ;;  %v709_v41 = vsel %vm323_vm6, %v706_v31, %v708_v32 }
 0x168   : > { %542 = vmatpush.msra.mxu0 %v501_v27  ;;  %562 = vmatpush.msra.mxu1 %v502_v29 }
 0x169   : > { %921 = vmatmul.msk.f32.vlgmr.msra.gmra.mxu0 %vm517_vm7, %v500_v28  ;;  %923 = vmatmul.msk.f32.vlgmr.msra.gmra.mxu1 %vm517_vm7, %v500_v28 }
 0x16d   : > { %v673_v33 = vpop.permute.xlu1 %672 }
 0x16e   : > { %v651_v42 = vpop.permute.xlu0 %650  ;;  %v676_v44 = vsel %vm375_vm5, %v673_v33, %v675_v40 }
 0x175   : > { %v653_v45 = vpop.permute.xlu1 %652 }
 0x176   : > { %v629_v49 = vpop.permute.xlu0 %628  ;;  %v654_v51 = vsel %vm400_vm4, %v651_v42, %v653_v45 }
 0x177   : > { %v630_v50 = vsel %vm387_vm3, %v627_v47, %v629_v49 }
 0x17d   : > { %v605_v52 = vpop.permute.xlu1 %604 }
 0x17e   : > { %v608_v58 = vsel %vm363_vm2, %v605_v52, %v607_v56  ;;  %v570_v63 = vpop.permute.xlu0 %569 }
 0x185   : > { %v572_v62 = vpop.permute.xlu1 %571 }
 0x186   : > { %v573_v0 = vsel %vm311_vm1, %v570_v63, %v572_v62 }
 0x1e6   : > { %v544_v34 = vpop.f32.mrf.mxu0  ;;  %v564_v35 = vpop.f32.mrf.mxu1 }
 0x1e7   : > { %v545_v36 = vadd.f32 %v544_v34, %v515_v30  ;;  %v565_v37 = vadd.f32 %v564_v35, %v515_v30 }
 0x1e9   : > { %v1400_v38 = vmax.f32 %v545_v36, 0.0  ;;  %v1402_v39 = vmax.f32 %v565_v37, 0.0  ;;  %v727_v36 = vld [vmem:[#allocation9] sm:$0xff] }
 0x1eb   : > { %694 = vrot.lane.b32.xlu1 %v1400_v38, %s1186_s26  ;;  %696 = vrot.lane.b32.xlu2 %v1402_v39, %s1186_s26  ;;  %v713_v43 = vmul.f32 %v709_v41, %v1402_v39  ;;  %v680_v46 = vmul.f32 %v676_v44, %v1402_v39  ;;  %v679_v48 = vmul.f32 %v673_v33, %v1400_v38 }
 0x1ec   : > { %v712_v53 = vmul.f32 %v706_v31, %v1400_v38  ;;  %v633_v54 = vmul.f32 %v630_v50, %v1400_v38  ;;  %v658_v55 = vmul.f32 %v654_v51, %v1402_v39  ;;  %v612_v59 = vmul.f32 %v607_v56, %v1402_v39 }
 0x1ed   : > { %718 = vrot.lane.b32.xlu0 %v713_v43, %s1180_s9  ;;  %v657_v60 = vmul.f32 %v651_v42, %v1400_v38  ;;  %v611_v61 = vmul.f32 %v608_v58, %v1400_v38  ;;  %v576_v1 = vmul.f32 %v573_v0, %v1400_v38  ;;  %v634_v2 = vmul.f32 %v629_v49, %v1402_v39 }
 0x1ee   : > { %v577_v3 = vmul.f32 %v572_v62, %v1402_v39 }
 0x1f3   : > { %593 = vrot.lane.b32.xlu2 %v1400_v38, %s1187_s28  ;;  %685 = vrot.lane.b32.xlu1 %v680_v46, %s1183_s13 }
 0x1f5   : > { %683 = vrot.lane.b32.xlu0 %v679_v48, %s1183_s13 }
 0x1fb   : > { %716 = vrot.lane.b32.xlu2 %v712_v53, %s1180_s9  ;;  %637 = vrot.lane.b32.xlu1 %v633_v54, %s1184_s14  ;;  %s1125_s9 = scalar_lea.hbm %s1509_s6, 32 }
 0x1fd   : > { %663 = vrot.lane.b32.xlu0 %v658_v55, %s1181_s11 }
 0x203   : > { %661 = vrot.lane.b32.xlu2 %v657_v60, %s1181_s11  ;;  %617 = vrot.lane.b32.xlu1 %v612_v59, %s1182_s12 }
 0x205   : > { %615 = vrot.lane.b32.xlu0 %v611_v61, %s1182_s12  ;;  %s286_s12 = sand.u32 1, %s1167_s22  }
 0x206   : > { %s917_s13 = sshll.u32 %s286_s12, 4 }
 0x207   : > { %s288_s18 = scalar_lea.vmem [#allocation10], %s917_s13 }
 0x208   : > { %s814_s19 = sshll.u32 %s288_s18, 4  ;;  %s815_s19 = int_to_ptr.vmem [resolvable:$true] %s814_s19 }
 0x20b   : > { %639 = vrot.lane.b32.xlu2 %v634_v2, %s1184_s14  ;;  %580 = vrot.lane.b32.xlu1 %v576_v1, %s1185_s15  ;;  %s932_s14 = sshll.u32 %s1246_s25, 4  ;;  %s801_s25 = scalar_lea.sflag [#allocation6], %s286_s12 }
 0x20c   : > { %s812_s17 = scalar_lea.hbm %s1509_s6, %s932_s14 }
 0x20d   : > { %595 = vrot.lane.b32.xlu0 %v1402_v39, %s1187_s28  ;;  %s816_s20 = sshll.u32 %s812_s17, 4  ;;  %s817_s20 = int_to_ptr.hbm [resolvable:$true] %s816_s20 }
 0x20e   : > { %s1119_s26 = sshra.s32 %s817_s20, 4  ;;  %s1120_s26 = int_to_ptr.hbm [resolvable:$true] %s1119_s26 }
 0x20f   : > { %s1121_s28 = scalar_lea.hbm %s1120_s26, 16  ;;  %p1126_p3 = scmp.lt.s32.totalorder %s1120_s26, %s1509_s6 }
 0x210   : > { %p1122_p0 = scmp.ne.s32.totalorder %s1120_s26, %s1121_s28  ;;  %p1127_p4 = scmp.lt.s32.totalorder %s1125_s9, %s1121_s28 }
 0x212   : > { %p1123_p1 = pnand %p1122_p0, %p1263_p5  ;;  %p1128_p7 = por %p1127_p4, %p1126_p3 }
 0x213   : > { %582 = vrot.lane.b32.xlu2 %v577_v3, %s1185_s15 }
 0x214   : > { %p1124_p2 = pneg %p1123_p1 }
 0x215   : > { %749 = vperm.xlu0 %1014, %v746_v19  }
 0x216   : > { %p1129_p8 = pnand %p1128_p7, %p1124_p2 }
 0x245   : > { %v697_v6 = vpop.permute.xlu2 %696 }
 0x246   : > { %702 = vst.msk [vmem:[#allocation3 + $0x78] sm:$0xff] %vm469_vm12, %v697_v6 }
 0x247   : > { %704 = vst.msk [vmem:[#allocation3 + $0x78] sm:$0xff] %vm703_vm0, %v1188_v57 }
 0x24d   : > { %v594_v7 = vpop.permute.xlu2 %593 }
 0x24e   : > { %601 = vst.msk [vmem:[#allocation3 + $0x10] sm:$0xff] %vm600_vm8, %v594_v7  ;;  %v743_v18 = vld [vmem:[#allocation3 + $0x78] sm:$0xff] }
 0x24f   : > { %603 = vst.msk [vmem:[#allocation3 + $0x10] sm:$0xff] %vm341_vm15, %v1188_v57 }
 0x255   : > { %v717_v9 = vpop.permute.xlu2 %716 }
 0x256   : > { %v730_v35 = vld [vmem:[#allocation3 + $0x10] sm:$0xff] }
 0x25d   : > { %v695_v11 = vpop.permute.xlu1 %694  ;;  %v662_v15 = vpop.permute.xlu2 %661 }
 0x25e   : > { %v698_v12 = vsel %vm469_vm12, %v695_v11, %v697_v6 }
 0x25f   : > { %v719_v13 = vpop.permute.xlu0 %718 }
 0x260   : > { %v720_v14 = vsel %vm311_vm1, %v717_v9, %v719_v13  ;;  %724 = vst.msk [vmem:[#allocation3 + $0x88] sm:$0xff] %vm311_vm1, %v719_v13  ;;  %vm644_vm1 = vcmask 1047560  }
 0x261   : > { %763 = vmatpush.msra.mxu2 %v720_v14  ;;  %726 = vst.msk [vmem:[#allocation3 + $0x88] sm:$0xff] %vm725_vm9, %v1188_v57 }
 0x263   : > { %764 = vmatpush.msra.mxu2 %v698_v12 }
 0x265   : > { %v686_v4 = vpop.permute.xlu1 %685  ;;  %v640_v10 = vpop.permute.xlu2 %639 }
 0x266   : > { %691 = vst.msk [vmem:[#allocation3 + $0x68] sm:$0xff] %vm363_vm2, %v686_v4 }
 0x267   : > { %693 = vst.msk [vmem:[#allocation3 + $0x68] sm:$0xff] %vm692_vm10, %v1188_v57  ;;  %v684_v16 = vpop.permute.xlu0 %683 }
 0x268   : > { %v687_v17 = vsel %vm363_vm2, %v684_v16, %v686_v4  ;;  %v745_v8 = vld [vmem:[#allocation3 + $0x88] sm:$0xff]  ;;  %vm670_vm2 = vcmask 1048568  }
 0x269   : > { %765 = vmatpush.msra.mxu2 %v687_v17  ;;  %783 = vmatpush.msra.mxu3 %v745_v8 }
 0x26b   : > { %784 = vmatpush.msra.mxu3 %v743_v18 }
 0x26d   : > { %v638_v20 = vpop.permute.xlu1 %637  ;;  %v583_v29 = vpop.permute.xlu2 %582 }
 0x26e   : > { %v641_v21 = vsel %vm400_vm4, %v638_v20, %v640_v10  ;;  %645 = vst.msk [vmem:[#allocation3 + $0x30] sm:$0xff] %vm644_vm1, %v638_v20  ;;  %v741_v22 = vld [vmem:[#allocation3 + $0x68] sm:$0xff] }
 0x26f   : > { %v664_v23 = vpop.permute.xlu0 %663  ;;  %785 = vmatpush.msra.mxu3 %v741_v22  ;;  %647 = vst.msk [vmem:[#allocation3 + $0x30] sm:$0xff] %vm400_vm4, %v1188_v57  ;;  %vm587_vm4 = vcmask 1047688  }
 0x270   : > { %v665_v5 = vsel %vm387_vm3, %v662_v15, %v664_v23  ;;  %669 = vst.msk [vmem:[#allocation3 + $0x58] sm:$0xff] %vm387_vm3, %v664_v23  ;;  %vm752_vm3 = vcmask 588800  }
 0x271   : > { %766 = vmatpush.msra.mxu2 %v665_v5  ;;  %671 = vst.msk [vmem:[#allocation3 + $0x58] sm:$0xff] %vm670_vm2, %v1188_v57 }
 0x273   : > { %767 = vmatpush.msra.mxu2 %v1400_v38 }
 0x275   : > { %v618_v24 = vpop.permute.xlu1 %617 }
 0x276   : > { %v734_v26 = vld [vmem:[#allocation3 + $0x30] sm:$0xff] }
 0x277   : > { %v616_v25 = vpop.permute.xlu0 %615  ;;  %768 = vmatpush.msra.mxu2 %v734_v26 }
 0x278   : > { %v619_v27 = vsel %vm375_vm5, %v616_v25, %v618_v24  ;;  %623 = vst.msk [vmem:[#allocation3 + $0x20] sm:$0xff] %vm622_vm11, %v616_v25  ;;  %v739_v28 = vld [vmem:[#allocation3 + $0x58] sm:$0xff] }
 0x279   : > { %625 = vst.msk [vmem:[#allocation3 + $0x20] sm:$0xff] %vm375_vm5, %v1188_v57  ;;  %786 = vmatpush.msra.mxu3 %v739_v28 }
 0x27b   : > { %787 = vmatpush.msra.mxu3 %v1402_v39 }
 0x27d   : > { %v581_v30 = vpop.permute.xlu1 %580  ;;  %788 = vmatpush.msra.mxu3 %v641_v21 }
 0x27e   : > { %v584_v31 = vsel %vm323_vm6, %v581_v30, %v583_v29  ;;  %588 = vst.msk [vmem:[#allocation3] sm:$0xff] %vm587_vm4, %v581_v30 }
 0x27f   : > { %v596_v32 = vpop.permute.xlu0 %595  ;;  %590 = vst.msk [vmem:[#allocation3] sm:$0xff] %vm323_vm6, %v1188_v57  ;;  %789 = vmatpush.msra.mxu3 %v619_v27 }
 0x280   : > { %v597_v33 = vsel %vm341_vm15, %v594_v7, %v596_v32  ;;  %v732_v34 = vld [vmem:[#allocation3 + $0x20] sm:$0xff] }
 0x281   : > { %769 = vmatpush.msra.mxu2 %v732_v34  ;;  %790 = vmatpush.msra.mxu3 %v597_v33 }
 0x283   : > { %770 = vmatpush.msra.mxu2 %v730_v35  ;;  %791 = vmatpush.msra.mxu3 %v584_v31 }
 0x284   : > { %925 = vmatmul.msk.f32.vlgmr.msra.gmra.mxu3 %vm752_vm3, %v727_v36 }
 0x286   : > { %v728_v37 = vld [vmem:[#allocation3] sm:$0xff] }
 0x287   : > { %771 = vmatpush.msra.mxu2 %v728_v37  ;;  %v750_v57 = vpop.permute.xlu0 %749 }
 0x288   : > { %924 = vmatmul.msk.f32.vlgmr.msra.gmra.mxu2 %vm752_vm3, %v727_v36 }
 0x307   : > { %v793_v38 = vpop.f32.mrf.mxu3 }
 0x308   : > { %v794_v39 = vadd.f32 %v793_v38, %v750_v57 }
 0x30a   : > { %v797_v41 = vmax.f32 %v794_v39, 0.0 }
 0x30b   : > { %v773_v40 = vpop.f32.mrf.mxu2 }
 0x30c   : > { %v774_v42 = vadd.f32 %v773_v40, %v750_v57  ;;  %799 = vst [vmem:[%s288_s18 + $0x8] sm:$0xff] %v797_v41 }
 0x30e   : > { %v796_v43 = vmax.f32 %v774_v42, 0.0 }
 0x310   : > { %798 = vst [vmem:[%s288_s18] sm:$0xff] %v796_v43 }
 0x311   : > { %1132 = shalt.err (!%p1129_p8)
}
 0x312   : > { %945 = dma.vmem_to_hbm [thread:$0]  (%p1263_p5), %s815_s19, 256, %s817_s20, %s801_s25  }
 0x313 PF: > { %p967_p9 = scmp.ge.s32.totalorder %s1175_s24, 2  ;;  %s828_s12 = sand.u32 1, %s1163_s21  }
 0x314   : > { %s829_s14 = scalar_lea.sflag [#allocation6], %s828_s12 }
 0x315   : > { %p958_p10 = pnand %p967_p9, %p1267_p6 }
 0x317   : > { %p959_p11 = pneg %p958_p10 }
 0x319   : > { %1158 = dma.done.wait (%p959_p11), %s829_s14, 256  }
 0x31a   : > { %1160 = vsyncadd (%p959_p11), %s829_s14, 4294967040  ;;  %p18_p12 = scmp.ge.s32.totalorder %s1250_s27, 4   ;;  %s1513_s21 = smov %s1167_s22 }
 0x31b   : > { %s1514_s22 = smov %s1171_s23  ;;  %s1515_s23 = smov %s1261_s30 }
 0x31c   : > { %s1516_s24 = smov %s1250_s27  ;;  %20 = sbr.rel (!%p18_p12) target bundleno = 5 (0x5), region = 96 }
 0x321   :  { %835 = vsyncpa [#allocation5], 1 }
 0x322   :  { %837 = vsyncpa [#allocation5 + $0x1], 1 }
 0x323   :  { %838 = vsyncpa [#allocation8], 1 }
 0x324   :  { %839 = vsyncpa [#allocation6], 1 }
 0x325   :  { %841 = vsyncpa [#allocation6 + $0x1], 1 }

</bundles_post_ra>
